<compile_context>
chip_gen: v6e
topology: v6e:2x2x1
jax: 0.10.0
libtpu: 0.0.40
codegen_flags: <defaults>
</compile_context>

<pallas_src>
import numpy as np
import jax
import jax.numpy as jnp
from jax import lax
from jax.experimental import pallas as pl
from jax.experimental.pallas import tpu as pltpu


def fuse_loss_kernel(logits_ref, p_ref, y_ref, ww_ref, out_ref):
    # logits_ref: (1, TRb, C) native dtype; p_ref: (1, TRb, 1) f32
    # y_ref: (TRb, 1) int32;  ww_ref: (TRb, 1) f32 (= w[y]/sum_b w[y], 0 for pad rows)
    # out_ref: (1, 1, 8, 128) f32 per-tile partial (broadcast, lane-dense store)
    logits = logits_ref[0].astype(jnp.float32)          # (TRb, C)
    p = p_ref[0]                                         # (TRb, 1)
    yv = y_ref[...]                                      # (TRb, 1)
    ww = ww_ref[...]                                     # (TRb, 1)

    TR, C = logits.shape
    col = lax.broadcasted_iota(jnp.int32, (TR, C), 1)
    index = col == yv                                    # one-hot target mask

    # scale = mean(|logits|, dim=-1, keepdim=True)
    scale = jnp.mean(jnp.abs(logits), axis=-1, keepdims=True)        # (TR, 1)

    # variation is nonzero only at the target column; its value there is
    # p * scale (p pre-gathered/pre-folded in the wrapper).
    adj = logits - jnp.where(index, p * scale, 0.0)                  # (TR, C)

    # per-row NLL = logsumexp(adj) - adj[target]
    m = jnp.max(adj, axis=-1, keepdims=True)
    lse = m + jnp.log(jnp.sum(jnp.exp(adj - m), axis=-1, keepdims=True))
    tgt = jnp.sum(jnp.where(index, adj, 0.0), axis=-1, keepdims=True)
    nll = lse - tgt                                                  # (TR, 1)

    # partial sum for this (expert, row-block) tile; padded rows have ww = 0.
    partial = jnp.sum(ww * nll)
    out_ref[...] = jnp.full(out_ref.shape, partial, dtype=jnp.float32)


def fuse_loss_pallas(logits_stack, noise_stack, y, gcl_m_list, per_cls_weights,
                     *, row_block=None):
    """logits_stack, noise_stack: (E, B, C); y: (B,); gcl/w: (C,)."""
    E, B, C = logits_stack.shape
    y = y.astype(jnp.int32)

    # ---- hoisted, expert-invariant / gathered prep (tiny XLA ops) ----------
    # NOTE: gcl.max() == 0 (all class counts equal) yields inf/nan, exactly
    # like the PyTorch reference.
    gcl = gcl_m_list.astype(jnp.float32)
    gcl_max = jnp.max(gcl)
    # Only the target column of the noise matters -> gather it and fold in the
    # 0.5 (gcl_noise_mul) and gcl[y]/gcl.max() class factor. The (E,B,C) noise
    # tensor never reaches the kernel / HBM stream.
    noise_t = noise_stack[:, jnp.arange(B), y].astype(jnp.float32)        # (E, B)
    p = 0.5 * jnp.abs(jnp.clip(noise_t, -1.0, 1.0)) * (gcl[y] / gcl_max)  # (E, B)
    p3 = p[..., None]                                                     # (E, B, 1)

    wy = per_cls_weights.astype(jnp.float32)[y]                           # (B,)
    ww2 = (wy / jnp.sum(wy))[:, None]                                     # (B, 1)
    y2 = y[:, None]                                                       # (B, 1)

    # ---- batch-row tiling; experts are a second parallel grid axis ---------
    if row_block is None:
        # TODO(synk): for production (large B, C) re-derive per generation so
        # (streamed inputs x 2 double-buffers x TRb x C x dtype_bytes) fits the
        # scoped VMEM budget (v7x 64 MiB phys / 32 MiB default; v6e 128/32;
        # v5e 128/16); consider pipeline_mode=pl.Buffered(3) on logits on v7x.
        row_block = min(128, ((B + 7) // 8) * 8)
    TRb = max(8, (row_block // 8) * 8)            # sublane-aligned row block
    Bp = ((B + TRb - 1) // TRb) * TRb
    NB = Bp // TRb
    if Bp != B:
        pad = Bp - B
        logits_stack = jnp.pad(logits_stack, ((0, 0), (0, pad), (0, 0)))
        p3 = jnp.pad(p3, ((0, 0), (0, pad), (0, 0)))
        y2 = jnp.pad(y2, ((0, pad), (0, 0)))
        ww2 = jnp.pad(ww2, ((0, pad), (0, 0)))    # zero weight -> contributes 0

    out = pl.pallas_call(
        fuse_loss_kernel,
        out_shape=jax.ShapeDtypeStruct((E, NB, 8, 128), jnp.float32),
        grid_spec=pltpu.PrefetchScalarGridSpec(
            num_scalar_prefetch=0,
            grid=(E, NB),
            in_specs=[
                # logits streamed in native dtype (bf16 callers halve HBM bytes)
                pl.BlockSpec((1, TRb, C), lambda e, b: (e, b, 0)),
                pl.BlockSpec((1, TRb, 1), lambda e, b: (e, b, 0)),   # prefactor p
                pl.BlockSpec((TRb, 1), lambda e, b: (b, 0)),         # y, shared across experts
                pl.BlockSpec((TRb, 1), lambda e, b: (b, 0)),         # ww, shared across experts
            ],
            # Per-tile partial written once to its own lane-dense (8,128) block.
            out_specs=pl.BlockSpec((1, 1, 8, 128), lambda e, b: (e, b, 0, 0)),
        ),
        compiler_params=pltpu.CompilerParams(
            dimension_semantics=("parallel", "parallel"),
            vmem_limit_bytes=32 << 20,
        ),
    )(logits_stack, p3, y2, ww2)

    # total = sum of per-tile weighted partial sums
    return jnp.sum(out[:, :, 0, 0])


def fuse_loss_ref(logits_stack, noise_stack, y, gcl_m_list, per_cls_weights):
    """Pure-JAX reference mirroring the PyTorch forward (else-branch),
    using the FULL (E,B,C) noise tensor (validates the gathered-prefactor
    algebra in the kernel)."""
    E, B, C = logits_stack.shape
    index = jax.nn.one_hot(y, C, dtype=jnp.float32) > 0
    gcl_max = jnp.max(gcl_m_list)
    total = 0.0
    for i in range(E):
        logits = logits_stack[i].astype(jnp.float32)
        scale = jnp.mean(jnp.abs(logits), axis=-1, keepdims=True)
        variation = 0.5 * jnp.abs(jnp.clip(noise_stack[i].astype(jnp.float32),
                                           -1.0, 1.0)) \
            / gcl_max * gcl_m_list[None, :]
        variation = variation * scale
        adj = jnp.where(index, logits - variation, logits)
        logz = jax.scipy.special.logsumexp(adj, axis=-1)
        nll = logz - adj[jnp.arange(B), y]
        wy = per_cls_weights[y]
        total = total + jnp.sum(wy * nll) / jnp.sum(wy)
    return total


if __name__ == "__main__":
    # --- deterministic "module init" (mirrors FuseLoss.__init__) -----------
    C = 16            # number of classes
    B = 16            # batch size
    E = 3             # num_expert
    reweight_epoch = 30
    epoch = 40        # epoch > reweight_epoch -> use per_cls_weights_enabled

    cls_num_list = np.array(
        [100, 70, 50, 35, 25, 18, 13, 9, 7, 5, 4, 3, 3, 2, 2, 2],
        dtype=np.float64)
    assert len(cls_num_list) == C

    # gcl_m_list = log(cls).max() - log(cls)
    gcl_m_list = np.log(cls_num_list)
    gcl_m_list = gcl_m_list.max() - gcl_m_list

    # per_cls_weights_enabled (effective-number reweighting, beta=0.9999)
    beta = 0.9999
    effective_num = 1.0 - np.power(beta, cls_num_list)
    per_cls_weights = (1.0 - beta) / effective_num
    per_cls_weights = per_cls_weights / np.sum(per_cls_weights) * C
    weight_vec = per_cls_weights if epoch > reweight_epoch else np.ones(C)

    # TODO(synk): variable_cloud_size=True branch needs the external
    # `gen_uncertainty` network (None by default); only the default GCL-noise
    # branch is implemented. m_list / diversity weights / get_final_output are
    # unused by forward() and therefore omitted.

    # --- deterministic example inputs --------------------------------------
    key = jax.random.PRNGKey(0)
    k_logits, k_y, k_noise = jax.random.split(key, 3)
    logits_stack = jax.random.normal(k_logits, (E, B, C), dtype=jnp.float32) * 3.0
    y = jax.random.randint(k_y, (B,), 0, C, dtype=jnp.int32)
    cloud_size = 1.0 / 3.0
    # Normal(0, cloud_size) samples (the stochastic part of forward());
    # generated in glue so the kernel itself is deterministic given `noise`.
    noise_stack = cloud_size * jax.random.normal(k_noise, (E, B, C),
                                                 dtype=jnp.float32)

    gcl_j = jnp.asarray(gcl_m_list, dtype=jnp.float32)
    w_j = jnp.asarray(weight_vec, dtype=jnp.float32)

    # row_block=8 exercises both grid axes (grid = (E, B//8) = (3, 2)).
    loss = fuse_loss_pallas(logits_stack, noise_stack, y, gcl_j, w_j,
                            row_block=8)
    loss = jax.block_until_ready(loss)

    loss_ref = fuse_loss_ref(logits_stack, noise_stack, y, gcl_j, w_j)
    np.testing.assert_allclose(np.asarray(loss), np.asarray(loss_ref),
                               rtol=1e-5, atol=1e-5)
    print("KERNEL_OK")
</pallas_src>

<mosaic_0001>
module attributes {stable_mosaic.version = 11 : i64} {
  func.func @fuse_loss_kernel(%arg0: i32, %arg1: i32, %arg2: memref<1x8x16xf32, #tpu.memory_space<vmem>>, %arg3: memref<1x8x1xf32, #tpu.memory_space<vmem>>, %arg4: memref<8x1xi32, #tpu.memory_space<vmem>>, %arg5: memref<8x1xf32, #tpu.memory_space<vmem>>, %arg6: memref<1x1x8x128xf32, #tpu.memory_space<vmem>>) attributes {dimension_semantics = [#tpu.dimension_semantics<parallel>, #tpu.dimension_semantics<parallel>], iteration_bounds = array<i64: 3, 2>, scalar_prefetch = 0 : i64, scratch_operands = 0 : i64, tpu.core_type = #tpu.core_type<tc>, window_params = [{transform_indices = @transform_0, window_bounds = array<i64: 1, 8, 16>}, {transform_indices = @transform_1, window_bounds = array<i64: 1, 8, 1>}, {transform_indices = @transform_2, window_bounds = array<i64: 8, 1>}, {transform_indices = @transform_3, window_bounds = array<i64: 8, 1>}, {transform_indices = @transform_4, window_bounds = array<i64: 1, 1, 8, 128>}]} {
    %c0 = arith.constant 0 : index
    %c0_0 = arith.constant 0 : index
    %c0_1 = arith.constant 0 : index
    %0 = vector.load %arg2[%c0, %c0_0, %c0_1] : memref<1x8x16xf32, #tpu.memory_space<vmem>>, vector<1x8x16xf32>
    %1 = vector.shape_cast %0 : vector<1x8x16xf32> to vector<8x16xf32>
    %c0_2 = arith.constant 0 : index
    %c0_3 = arith.constant 0 : index
    %c0_4 = arith.constant 0 : index
    %2 = vector.load %arg3[%c0_2, %c0_3, %c0_4] : memref<1x8x1xf32, #tpu.memory_space<vmem>>, vector<1x8x1xf32>
    %3 = vector.shape_cast %2 : vector<1x8x1xf32> to vector<8x1xf32>
    %c0_5 = arith.constant 0 : index
    %c0_6 = arith.constant 0 : index
    %4 = vector.load %arg4[%c0_5, %c0_6] : memref<8x1xi32, #tpu.memory_space<vmem>>, vector<8x1xi32>
    %c0_7 = arith.constant 0 : index
    %c0_8 = arith.constant 0 : index
    %5 = vector.load %arg5[%c0_7, %c0_8] : memref<8x1xf32, #tpu.memory_space<vmem>>, vector<8x1xf32>
    %6 = tpu.iota {dimensions = array<i32: 1>} : vector<8x16xi32>
    %7 = vector.broadcast %4 : vector<8x1xi32> to vector<8x16xi32>
    %8 = arith.cmpi eq, %6, %7 : vector<8x16xi32>
    %9 = math.absf %1 : vector<8x16xf32>
    %cst = arith.constant dense<0.000000e+00> : vector<8xf32>
    %10 = vector.multi_reduction <add>, %9, %cst [1] : vector<8x16xf32> to vector<8xf32>
    %11 = vector.shape_cast %10 : vector<8xf32> to vector<8x1xf32>
    %cst_9 = arith.constant 1.600000e+01 : f32
    %12 = vector.broadcast %cst_9 : f32 to vector<8x1xf32>
    %13 = arith.divf %11, %12 : vector<8x1xf32>
    %14 = arith.mulf %3, %13 : vector<8x1xf32>
    %cst_10 = arith.constant 0.000000e+00 : f32
    %15 = vector.shape_cast %14 : vector<8x1xf32> to vector<8x1xf32>
    %16 = vector.broadcast %15 : vector<8x1xf32> to vector<8x16xf32>
    %17 = vector.broadcast %cst_10 : f32 to vector<8x16xf32>
    %18 = arith.select %8, %16, %17 : vector<8x16xi1>, vector<8x16xf32>
    %19 = arith.subf %1, %18 : vector<8x16xf32>
    %cst_11 = arith.constant dense<0xFF800000> : vector<8xf32>
    %20 = vector.multi_reduction <maximumf>, %19, %cst_11 [1] : vector<8x16xf32> to vector<8xf32>
    %21 = vector.shape_cast %20 : vector<8xf32> to vector<8x1xf32>
    %22 = vector.broadcast %21 : vector<8x1xf32> to vector<8x16xf32>
    %23 = arith.subf %19, %22 : vector<8x16xf32>
    %24 = math.exp %23 : vector<8x16xf32>
    %cst_12 = arith.constant dense<0.000000e+00> : vector<8xf32>
    %25 = vector.multi_reduction <add>, %24, %cst_12 [1] : vector<8x16xf32> to vector<8xf32>
    %26 = vector.shape_cast %25 : vector<8xf32> to vector<8x1xf32>
    %27 = math.log %26 : vector<8x1xf32>
    %28 = arith.addf %21, %27 : vector<8x1xf32>
    %cst_13 = arith.constant 0.000000e+00 : f32
    %29 = vector.broadcast %cst_13 : f32 to vector<8x16xf32>
    %30 = arith.select %8, %19, %29 : vector<8x16xi1>, vector<8x16xf32>
    %cst_14 = arith.constant dense<0.000000e+00> : vector<8xf32>
    %31 = vector.multi_reduction <add>, %30, %cst_14 [1] : vector<8x16xf32> to vector<8xf32>
    %32 = vector.shape_cast %31 : vector<8xf32> to vector<8x1xf32>
    %33 = arith.subf %28, %32 : vector<8x1xf32>
    %34 = arith.mulf %5, %33 : vector<8x1xf32>
    %35 = vector.shape_cast %34 : vector<8x1xf32> to vector<1x8x1xf32>
    %cst_15 = arith.constant dense<0.000000e+00> : vector<1xf32>
    %36 = vector.multi_reduction <add>, %35, %cst_15 [1, 2] : vector<1x8x1xf32> to vector<1xf32>
    %37 = vector.shape_cast %36 : vector<1xf32> to vector<1x1x1xf32>
    %38 = vector.extract %37[0, 0, 0] : f32 from vector<1x1x1xf32>
    %39 = vector.broadcast %38 : f32 to vector<1x1x8x128xf32>
    %c0_16 = arith.constant 0 : index
    %c0_17 = arith.constant 0 : index
    %c0_18 = arith.constant 0 : index
    %c0_19 = arith.constant 0 : index
    %40 = vector.load %arg6[%c0_16, %c0_17, %c0_18, %c0_19] : memref<1x1x8x128xf32, #tpu.memory_space<vmem>>, vector<1x1x8x128xf32>
    tpu.vector_store %arg6[%c0_16, %c0_17, %c0_18, %c0_19], %39 {strides = array<i32>} : memref<1x1x8x128xf32, #tpu.memory_space<vmem>>, vector<1x1x8x128xf32>,
    return
  }
  func.func @transform_0(%arg0: i32, %arg1: i32) -> (i32, i32, i32) {
    %c0_i32 = arith.constant 0 : i32
    %c0_i32_0 = arith.constant 0 : i32
    return %arg0, %arg1, %c0_i32 : i32, i32, i32
  }
  func.func @transform_1(%arg0: i32, %arg1: i32) -> (i32, i32, i32) {
    %c0_i32 = arith.constant 0 : i32
    %c0_i32_0 = arith.constant 0 : i32
    return %arg0, %arg1, %c0_i32 : i32, i32, i32
  }
  func.func @transform_2(%arg0: i32, %arg1: i32) -> (i32, i32) {
    %c0_i32 = arith.constant 0 : i32
    %c0_i32_0 = arith.constant 0 : i32
    return %arg1, %c0_i32 : i32, i32
  }
  func.func @transform_3(%arg0: i32, %arg1: i32) -> (i32, i32) {
    %c0_i32 = arith.constant 0 : i32
    %c0_i32_0 = arith.constant 0 : i32
    return %arg1, %c0_i32 : i32, i32
  }
  func.func @transform_4(%arg0: i32, %arg1: i32) -> (i32, i32, i32, i32) {
    %c0_i32 = arith.constant 0 : i32
    %c0_i32_0 = arith.constant 0 : i32
    %c0_i32_1 = arith.constant 0 : i32
    return %arg0, %arg1, %c0_i32, %c0_i32_0 : i32, i32, i32, i32
  }
}

</mosaic_0001>

<bundles_post_ra>
// kernel: tpu_custom_call.1
= control target key start
LH: loop header
LB: loop body
LE: loop exit
PB: predicated region body
PF: predicated region fallthrough
CT: control target
= control target key end

     0   :  { %9 = vsyncpa [#allocation3], 0  ;;  %s847_s0 = inlined_call_operand.vmem [shape: f32[3,16,16], index: 0, kind: input, shape index: {}]   ;;  %s848_s1 = inlined_call_operand.vmem [shape: f32[3,16,1], index: 1, kind: input, shape index: {}]   ;;  %s849_s2 = inlined_call_operand.vmem [shape: s32[16,1], index: 2, kind: input, shape index: {}]   ;;  %s850_s3 = inlined_call_operand.vmem [shape: f32[16,1], index: 3, kind: input, shape index: {}]   ;;  %s851_s4 = inlined_call_operand.hbm [shape: f32[3,2,8,128], index: 4, kind: output, shape index: {}]  }
   0x1   :  { %11 = vsyncpa [#allocation3 + $0x1], 0  ;;  %s696_s15 = smov 0   ;;  %s698_s16 = smov 0  }
   0x2   :  { %s700_s17 = smov 0   ;;  %s702_s18 = smov 0  }
   0x3   :  { %s704_s19 = smov 0   ;;  %s706_s20 = smov 0  }
   0x4   :  { %s708_s21 = smov 0   ;;  %s710_s22 = smov 0  }
   0x5 LB: > { %s478_s23 = sadd.s32 4294967295, %s667_s22   ;;  %s479_s24 = sadd.s32 4294967294, %s667_s22   ;;  %s667_s22 = sphi %s710_s22, %s17_s22   ;;  %s663_s21 = sphi %s708_s21, %s860_s21   ;;  %s659_s20 = sphi %s706_s20, %s859_s20   ;;  %s655_s19 = sphi %s704_s19, %s858_s19   ;;  %s651_s18 = sphi %s702_s18, %s857_s18   ;;  %s647_s17 = sphi %s700_s17, %s856_s17   ;;  %s643_s16 = sphi %s698_s16, %s855_s16   ;;  %s639_s15 = sphi %s696_s15, %s854_s15  }
   0x6   : > { %s26_s25 = sadd.s32 1, %s659_s20  ;;  %s29_s26 = sadd.s32 1, %s663_s21 }
   0x7   : > { %p27_p0 = scmp.ge.s32.totalorder %s26_s25, 2  ;;  %p156_p1 = scmp.ne.s32.totalorder %s647_s17, %s643_s16 }
   0x8   : > { %p157_p2 = scmp.eq.s32.totalorder %s478_s23, 5  ;;  %p162_p5 = scmp.ne.s32.totalorder %s643_s16, %s639_s15 }
   0x9   : > { %s862_s25 = smov (%p27_p0, %s26_s25), 0  ;;  %s864_s26 = smov (!%p27_p0, %s29_s26), %s663_s21 }
   0xa   : > { %s142_s27 = ssub.s32 %s659_s20, %s862_s25  ;;  %p747_p3 = por %p157_p2, %p156_p1 }
   0xb   : > { %p31_p4 = scmp.ge.s32.totalorder %s864_s26, 3  ;;  %p163_p6 = scmp.eq.s32.totalorder %s479_s24, 5 }
   0xc   : > { %p482_p7 = scmp.ge.s32.totalorder %s667_s22, 1  ;;  %p217_p9 = scmp.lt.s32.totalorder %s667_s22, 7 }
   0xd   : > { %s866_s26 = smov (%p31_p4, %s864_s26), 0  ;;  %p756_p8 = por %p163_p6, %p162_p5 }
   0xe   : > { %s141_s30 = ssub.s32 %s663_s21, %s866_s26  ;;  %s146_s5 = sadd.s32 1, %s647_s17 }
   0xf   : > { %s143_s6 = sor.u32 %s142_s27, %s141_s30  ;;  %p218_p10 = pnand %p482_p7, %p217_p9 }
  0x10   : > { %p144_p11 = scmp.eq.s32.totalorder %s143_s6, 0  ;;  %p262_p12 = scmp.lt.s32.totalorder (!%p218_p10), %s655_s19, 2 }
  0x11   : > { %221 = sbr.rel (%p218_p10) target bundleno = 834 (0x342), region = 36  ;;  %p264_p13 = scmp.lt.s32.totalorder (!%p218_p10), %s651_s18, 1 }
  0x12   : > { %s765_s7 = scalar_select %p144_p11, %s647_s17, %s146_s5  }
  0x16   : > { %s263_s8 = scalar_select %p262_p12, %s655_s19, 2  ;;  %vm297_vm0 = vcmask 130048   ;;  %v669_v3 = vmov 0   ;;  %v290_v9 = vlaneseq  ;;  %vm329_vm2 = vcmask 7168  }
  0x17   : > { %s771_s9 = scalar_select %p264_p13, %s651_s18, 1  ;;  %569 = vset.pattern.permute.xlu0 %v669_v3  ;;  %570 = vset.pattern.permute.xlu1 %v669_v3 }
  0x18   : > { %s484_s10 = sshll.u32 %s263_s8, 1  ;;  %v291_v10 = vand.u32 127, %v290_v9 }
  0x19   : > { %s267_s11 = sadd.s32 %s484_s10, %s771_s9  ;;  %s488_s24 = sshll.u32 %s771_s9, 3 }
  0x1a   : > { %s485_s12 = sshll.u32 %s267_s11, 3  ;;  %s281_s5 = scalar_lea.vmem %s849_s2, %s488_s24 }
  0x1b   : > { %s269_s23 = scalar_lea.vmem %s847_s0, %s485_s12  ;;  %v288_v4 = vld [vmem:[%s281_s5] sm:$0xff]  ;;  %s277_s10 = scalar_lea.vmem %s848_s1, %s485_s12 }
  0x1c   : > { %v286_v0 = vld [vmem:[%s269_s23] sm:$0xff]  ;;  %s285_s13 = scalar_lea.vmem %s850_s3, %s488_s24  ;;  %s259_s9 = sand.u32 1, %s643_s16  }
  0x1d   : > { %v296_v1 = vand.u32 2147483647, %v286_v0  ;;  %v287_v6 = vld [vmem:[%s277_s10] sm:$0xff]  ;;  %s483_s14 = sshll.u32 %s259_s9, 3  ;;  %s491_s23 = sshll.u32 %s655_s19, 1 }
  0x1e   : > { %v289_v28 = vld [vmem:[%s285_s13] sm:$0xff]  ;;  %s354_s24 = sadd.s32 %s651_s18, %s491_s23  ;;  %s261_s27 = scalar_lea.vmem [#allocation2], %s483_s14 }
  0x1f   : > { %v298_v2 = vsel %vm297_vm0, %v296_v1, 0.0  ;;  %s358_s30 = sshll.u32 %s261_s27, 4  ;;  %s492_s5 = sshll.u32 %s354_s24, 7  ;;  %s798_s30 = int_to_ptr.vmem [resolvable:$true] %s358_s30 }
  0x20   : > { %299 = vadd.xlane.f32.xlu0 %v298_v2  ;;  %s356_s11 = scalar_lea.hbm %s851_s4, %s492_s5  ;;  %s343_s12 = scalar_lea.sflag [#allocation3], %s259_s9 }
  0x21   : > { %s575_s13 = scalar_lea.vmem %s798_s30, 128  ;;  %s670_s18 = smov [#allocation2]  }
  0x22   : > { %p576_p0 = scmp.ne.s32.totalorder %s798_s30, %s575_s13  ;;  %s579_s19 = sshll.u32 %s670_s18, 4  ;;  %s580_s19 = int_to_ptr.vmem [resolvable:$false] %s579_s19 }
  0x23   : > { %s581_s14 = scalar_lea.vmem %s580_s19, 256  ;;  %p582_p4 = scmp.lt.s32.totalorder %s798_s30, %s580_s19 }
  0x24   : > { %p577_p1 = pnand %p576_p0, %p747_p3  ;;  %p583_p5 = scmp.lt.s32.totalorder %s581_s14, %s575_s13 }
  0x26   : > { %p578_p2 = pneg %p577_p1  ;;  %p584_p6 = por %p583_p5, %p582_p4 }
  0x28   : > { %p585_p7 = pnand %p584_p6, %p578_p2 }
  0x36   : > { %293 = vperm.xlu0 %569, %v288_v4  }
  0xa9   : > { %v300_v5 = vpop.xlane.xlu0 %299 }
  0xaa   : > { %v302_v7 = vmul.f32 0.0625, %v300_v5 }
  0xac   : > { %v303_v8 = vmul.f32 %v302_v7, %v287_v6 }
  0xae   : > { %306 = vperm.xlu1 %570, %v303_v8  }
  0xb1   : > { %v294_v11 = vpop.permute.xlu0 %293 }
  0xb2   : > { %vm295_vm1 = vcmp.eq.s32.totalorder %v291_v10, %v294_v11 }
 0x129   : > { %v307_v12 = vpop.permute.xlu1 %306 }
 0x12a   : > { %v309_v13 = vsel %vm295_vm1, %v307_v12, 0.0 }
 0x12b   : > { %v310_v14 = vsub.f32 %v286_v0, %v309_v13 }
 0x12d   : > { %v311_v15 = vsel %vm297_vm0, %v310_v14, -inf  ;;  %v323_v21 = vsel %vm295_vm1, %v310_v14, 0.0 }
 0x12e   : > { %312 = vmax.xlane.f32.xlu1 %v311_v15  ;;  %v324_v22 = vsel %vm297_vm0, %v323_v21, 0.0 }
 0x1b7   : > { %v313_v16 = vpop.xlane.xlu1 %312 }
 0x1b8   : > { %v314_v17 = vsub.f32 %v310_v14, %v313_v16 }
 0x1ba   : > { %v315_v18 = vmul.f32 1.442695, %v314_v17 }
 0x1bc   : > { %571 = vpow2.f32 %v315_v18 }
 0x1c9   : > { %v572_v19 = vpop.eup %571 }
 0x1ca   : > { %v317_v20 = vsel %vm297_vm0, %v572_v19, 0.0 }
 0x1cb   : > { %318 = vadd.xlane.f32.xlu1 %v317_v20 }
 0x1cf   : > { %325 = vadd.xlane.f32.xlu1 %v324_v22 }
 0x254   : > { %v319_v23 = vpop.xlane.xlu1 %318 }
 0x255   : > { %573 = vlog2.f32 %v319_v23 }
 0x258   : > { %v326_v27 = vpop.xlane.xlu1 %325 }
 0x262   : > { %v574_v24 = vpop.eup %573 }
 0x263   : > { %v321_v25 = vmul.f32 0.6931472, %v574_v24 }
 0x265   : > { %v322_v26 = vadd.f32 %v321_v25, %v313_v16 }
 0x267   : > { %v327_v29 = vsub.f32 %v322_v26, %v326_v27 }
 0x269   : > { %v328_v30 = vmul.f32 %v327_v29, %v289_v28 }
 0x26b   : > { %v330_v31 = vsel %vm329_vm2, %v328_v30, 0.0 }
 0x26c   : > { %331 = vadd.xlane.f32.xlu0 %v330_v31 }
 0x2f5   : > { %v332_v32 = vpop.xlane.xlu0 %331 }
 0x2f6   : > { %v333_v33 = vrot.slane %v332_v32, 4 }
 0x2f8   : > { %v334_v34 = vadd.f32 %v333_v33, %v332_v32 }
 0x2fa   : > { %v335_v35 = vrot.slane %v334_v34, 2 }
 0x2fc   : > { %v336_v36 = vadd.f32 %v335_v35, %v334_v34 }
 0x2fe   : > { %v337_v37 = vrot.slane %v336_v36, 1 }
 0x300   : > { %v338_v38 = vadd.f32 %v337_v37, %v336_v36 }
 0x302   : > { %495 = vpush %v338_v38 }
 0x333   : > { %s496_s6 = spop %495 }
 0x334   : > { %v340_v39 = vstv %s496_s6 }
 0x335   : > { %341 = vst [vmem:[%s261_s27] sm:$0xff] %v340_v39 }
 0x336   : > { %588 = shalt.err (!%p585_p7)
}
 0x337   : > { %s589_s23 = scalar_lea.hbm %s356_s11, 128  ;;  %s593_s27 = scalar_lea.hbm %s851_s4, 768 }
 0x338   : > { %p590_p9 = scmp.ne.s32.totalorder %s356_s11, %s589_s23  ;;  %p594_p12 = scmp.lt.s32.totalorder %s356_s11, %s851_s4 }
 0x339   : > { %p595_p13 = scmp.lt.s32.totalorder %s593_s27, %s589_s23 }
 0x33a   : > { %p591_p10 = pnand %p590_p9, %p747_p3 }
 0x33b   : > { %p596_p0 = por %p595_p13, %p594_p12 }
 0x33c   : > { %p592_p11 = pneg %p591_p10 }
 0x33e   : > { %p597_p1 = pnand %p596_p0, %p592_p11 }
 0x340   : > { %600 = shalt.err (!%p597_p1)
}
 0x341   : > { %497 = dma.vmem_to_hbm [thread:$0]  (%p747_p3), %s798_s30, 128, %s356_s11, %s343_s12  }
 0x342 PF: > { %p503_p2 = scmp.ge.s32.totalorder %s667_s22, 2  ;;  %s370_s8 = sand.u32 1, %s639_s15  }
 0x343   : > { %s371_s10 = scalar_lea.sflag [#allocation3], %s370_s8 }
 0x344   : > { %p500_p4 = pnand %p503_p2, %p756_p8 }
 0x346   : > { %p501_p5 = pneg %p500_p4 }
 0x348   : > { %634 = dma.done.wait (%p501_p5), %s371_s10, 128  }
 0x349   : > { %636 = vsyncadd (%p501_p5), %s371_s10, 4294967168  ;;  %s17_s22 = sadd.s32 1, %s667_s22   ;;  %s854_s15 = smov %s643_s16 }
 0x34a   : > { %p14_p6 = scmp.ge.s32.totalorder %s17_s22, 8   ;;  %s855_s16 = smov %s647_s17 }
 0x34b   : > { %s856_s17 = smov %s765_s7  ;;  %s857_s18 = smov %s659_s20 }
 0x34c   : > { %s858_s19 = smov %s663_s21  ;;  %s859_s20 = smov %s862_s25 }
 0x34d   : > { %s860_s21 = smov %s866_s26  ;;  %16 = sbr.rel (!%p14_p6) target bundleno = 5 (0x5), region = 80 }
 0x352   :  { %376 = vsyncpa [#allocation3], 1 }
 0x353   :  { %378 = vsyncpa [#allocation3 + $0x1], 1 }

</bundles_post_ra>
